<compile_context>
chip_gen: v7x
topology: tpu7x:2x2x1
jax: 0.10.0
libtpu: 0.0.40
codegen_flags: <defaults>
</compile_context>

<pallas_src>
from typing import NamedTuple

import jax
import jax.numpy as jnp
from jax.experimental import pallas as pl
from jax.experimental.pallas import tpu as pltpu

_LANE = 128      # lane width: last-dim alignment
_SUBLANE = 8     # sublane count: second-to-last dim alignment
_MiB = 1024 * 1024


def _round_up(x, m):
    return (x + m - 1) // m * m


def _cdiv(a, b):
    return (a + b - 1) // b


def _vmem_capacity_bytes():
    try:
        return int(pltpu.get_tpu_info().vmem_capacity_bytes)
    except Exception:
        return 64 * _MiB  # conservative (v7x-sized) fallback


def _vmem_budgets():
    cap = _vmem_capacity_bytes()
    # Leave ~24 MiB headroom for compiler-internal scratch; never request more
    # than ~100 MiB even on 128 MiB parts.
    limit_cap = max(32 * _MiB, min(cap - 24 * _MiB, 100 * _MiB))
    # Whole-problem footprint threshold for the resident (M-grid-only) path:
    # ~20 MiB on v7x (64 MiB VMEM), ~48 MiB on v5e/v6e (128 MiB VMEM).
    small_max = max(8 * _MiB, min(48 * _MiB, limit_cap // 2))
    return limit_cap, small_max


# ----------------------------------------------------------------------------
# Kernels
# ----------------------------------------------------------------------------
def _linear_resident_kernel(x_ref, w_ref, b_ref, o_ref):
    # Whole K & N live in VMEM; grid (if any) runs over M only.
    acc = jnp.dot(x_ref[...], w_ref[...], preferred_element_type=jnp.float32)
    o_ref[...] = (acc + b_ref[...].astype(jnp.float32)).astype(o_ref.dtype)


def _linear_tiled_f32_kernel(x_ref, w_ref, b_ref, o_ref):
    # float32 output: the output block is resident across K, accumulate into it.
    k = pl.program_id(2)

    @pl.when(k == 0)
    def _():
        o_ref[...] = jnp.zeros_like(o_ref)

    o_ref[...] += jnp.dot(x_ref[...], w_ref[...], preferred_element_type=jnp.float32)

    @pl.when(k == pl.num_programs(2) - 1)
    def _():
        o_ref[...] += b_ref[...].astype(o_ref.dtype)   # bias added exactly once


def _linear_tiled_acc_kernel(x_ref, w_ref, b_ref, o_ref, acc_ref):
    # Non-f32 output: f32 scratch accumulator, cast on the final K step.
    k = pl.program_id(2)

    @pl.when(k == 0)
    def _():
        acc_ref[...] = jnp.zeros_like(acc_ref)

    acc_ref[...] += jnp.dot(x_ref[...], w_ref[...], preferred_element_type=jnp.float32)

    @pl.when(k == pl.num_programs(2) - 1)
    def _():
        o_ref[...] = (acc_ref[...] + b_ref[...].astype(jnp.float32)).astype(o_ref.dtype)


# ----------------------------------------------------------------------------
# Params (padding hoisted to init)
# ----------------------------------------------------------------------------
class TNetParams(NamedTuple):
    w_pad: jax.Array   # (Kp, Np): transposed weight, zero-padded once at init
    b_pad: jax.Array   # (1, Np)
    fan_in: int
    fan_out: int


def prepare_tnet_params(weight, bias):
    """weight: (fan_out, fan_in) [PyTorch layout]; bias: (fan_out,)."""
    fan_out, fan_in = weight.shape
    kp = _round_up(fan_in, _LANE)
    np_ = _round_up(fan_out, _LANE)
    w_t = jnp.asarray(weight).T
    w_pad = jnp.pad(w_t, ((0, kp - fan_in), (0, np_ - fan_out)))
    b_pad = jnp.pad(jnp.asarray(bias).reshape(1, -1), ((0, 0), (0, np_ - fan_out)))
    return TNetParams(w_pad=w_pad, b_pad=b_pad, fan_in=fan_in, fan_out=fan_out)


def init_tnet_params(key, fan_in, fan_out, dtype=jnp.float32):
    # nn.Linear default init: U(-1/sqrt(fan_in), 1/sqrt(fan_in)) for W and b.
    kw, kb = jax.random.split(key)
    bound = 1.0 / (fan_in ** 0.5)
    w = jax.random.uniform(kw, (fan_out, fan_in), dtype, minval=-bound, maxval=bound)
    b = jax.random.uniform(kb, (fan_out,), dtype, minval=-bound, maxval=bound)
    return prepare_tnet_params(w, b)


# ----------------------------------------------------------------------------
# Forward
# ----------------------------------------------------------------------------
def _pick_tk(kp, tk):
    """Largest multiple of 128 that is <= tk and divides kp (kp % 128 == 0)."""
    tk = max(_LANE, (tk // _LANE) * _LANE)
    if kp <= tk:
        return kp
    q = kp // _LANE
    for d in range(tk // _LANE, 0, -1):
        if q % d == 0:
            return d * _LANE
    return _LANE


def tnet_forward(x, params, *, tm=512, tn=512, tk=512, small_path_max_bytes=None):
    """x: (B, fan_in) -> (B, fan_out) = x @ W^T + b, computed on the MXU."""
    B, fan_in = x.shape
    assert fan_in == params.fan_in, (fan_in, params.fan_in)
    fan_out = params.fan_out
    kp, np_ = params.w_pad.shape
    out_dtype = x.dtype

    mp = _round_up(B, _SUBLANE)
    # Only the activation is padded per call: zeros along K (required for a
    # correct contraction) and a cheap sublane round-up along M.
    if (mp, kp) != (B, fan_in):
        xp = jnp.pad(x, ((0, mp - B), (0, kp - fan_in)))
    else:
        xp = x

    x_item = jnp.dtype(x.dtype).itemsize
    w_item = jnp.dtype(params.w_pad.dtype).itemsize
    o_item = jnp.dtype(out_dtype).itemsize

    vmem_limit_cap, small_max_default = _vmem_budgets()
    if small_path_max_bytes is None:
        small_path_max_bytes = small_max_default

    footprint = (mp * kp * x_item + kp * np_ * w_item + np_ * w_item
                 + mp * np_ * o_item)

    if footprint <= small_path_max_bytes:
        # Resident path: whole K & N per block; >=2-way M grid (when M allows)
        # so both v7x TensorCores participate.
        tm_s = max(_SUBLANE, _round_up(_cdiv(mp, 2), _SUBLANE))
        tm_s = min(tm_s, mp)
        grid_m = _cdiv(mp, tm_s)

        need = (2 * (kp * np_ + np_) * w_item
                + 2 * tm_s * (kp * x_item + np_ * o_item))
        vmem_limit = int(min(vmem_limit_cap, max(16 * _MiB, need + need // 4)))

        yp = pl.pallas_call(
            _linear_resident_kernel,
            out_shape=jax.ShapeDtypeStruct((mp, np_), out_dtype),
            grid_spec=pltpu.PrefetchScalarGridSpec(
                num_scalar_prefetch=0,
                grid=(grid_m,),
                in_specs=[
                    pl.BlockSpec((tm_s, kp), lambda i: (i, 0)),
                    pl.BlockSpec((kp, np_), lambda i: (0, 0)),
                    pl.BlockSpec((1, np_), lambda i: (0, 0)),
                ],
                out_specs=pl.BlockSpec((tm_s, np_), lambda i: (i, 0)),
            ),
            compiler_params=pltpu.CompilerParams(
                dimension_semantics=("parallel",),
                vmem_limit_bytes=vmem_limit,
            ),
        )(xp, params.w_pad, params.b_pad)
    else:
        # Tiled M/N/K fallback for problems that don't fit VMEM.
        tm_ = max(_SUBLANE, (min(tm, mp) // _SUBLANE) * _SUBLANE)
        tn_ = max(_LANE, (min(tn, np_) // _LANE) * _LANE)
        tk_ = _pick_tk(kp, tk)
        grid_m = _cdiv(mp, tm_)
        grid_n = _cdiv(np_, tn_)
        grid_k = kp // tk_   # exact by construction

        use_out_acc = (jnp.dtype(out_dtype) == jnp.float32)
        need = (2 * (tm_ * tk_ * x_item + tk_ * tn_ * w_item + tn_ * w_item)
                + 2 * tm_ * tn_ * o_item)
        if not use_out_acc:
            need += tm_ * tn_ * 4
        vmem_limit = int(min(vmem_limit_cap, max(16 * _MiB, need + need // 4)))

        in_specs = [
            pl.BlockSpec((tm_, tk_), lambda i, j, k: (i, k)),
            pl.BlockSpec((tk_, tn_), lambda i, j, k: (k, j)),
            pl.BlockSpec((1, tn_), lambda i, j, k: (0, j)),
        ]
        out_specs = pl.BlockSpec((tm_, tn_), lambda i, j, k: (i, j))
        cparams = pltpu.CompilerParams(
            dimension_semantics=("parallel", "parallel", "arbitrary"),
            vmem_limit_bytes=vmem_limit,
        )
        out_shape = jax.ShapeDtypeStruct((mp, np_), out_dtype)

        if use_out_acc:
            yp = pl.pallas_call(
                _linear_tiled_f32_kernel,
                out_shape=out_shape,
                grid_spec=pltpu.PrefetchScalarGridSpec(
                    num_scalar_prefetch=0,
                    grid=(grid_m, grid_n, grid_k),
                    in_specs=in_specs,
                    out_specs=out_specs,
                ),
                compiler_params=cparams,
            )(xp, params.w_pad, params.b_pad)
        else:
            yp = pl.pallas_call(
                _linear_tiled_acc_kernel,
                out_shape=out_shape,
                grid_spec=pltpu.PrefetchScalarGridSpec(
                    num_scalar_prefetch=0,
                    grid=(grid_m, grid_n, grid_k),
                    in_specs=in_specs,
                    out_specs=out_specs,
                    scratch_shapes=[pltpu.VMEM((tm_, tn_), jnp.float32)],
                ),
                compiler_params=cparams,
            )(xp, params.w_pad, params.b_pad)

    if (mp, np_) != (B, fan_out):
        return yp[:B, :fan_out]
    return yp


if __name__ == "__main__":
    key = jax.random.PRNGKey(0)
    k_x, k_p, k_x2, k_p2, k_x3, k_p3 = jax.random.split(key, 6)

    # Small shape consistent with the TNet module (single Linear layer).
    batch, fan_in, fan_out = 8, 32, 16
    x = jax.random.normal(k_x, (batch, fan_in), dtype=jnp.float32)
    params = init_tnet_params(k_p, fan_in, fan_out)
    y = jax.block_until_ready(tnet_forward(x, params))
    y_ref = x @ params.w_pad[:fan_in, :fan_out] + params.b_pad[0, :fan_out]
    assert y.shape == (batch, fan_out)
    assert jnp.allclose(y, y_ref, atol=1e-5, rtol=1e-5)

    # Ragged (non-aligned) sizes: resident path with M/K padding on x only.
    B2, K2, N2 = 10, 20, 12
    x2 = jax.random.normal(k_x2, (B2, K2), dtype=jnp.float32)
    p2 = init_tnet_params(k_p2, K2, N2)
    y2 = jax.block_until_ready(tnet_forward(x2, p2))
    y2_ref = x2 @ p2.w_pad[:K2, :N2] + p2.b_pad[0, :N2]
    assert y2.shape == (B2, N2)
    assert jnp.allclose(y2, y2_ref, atol=1e-5, rtol=1e-5)

    # Medium shape: exercises (a) the resident 2-way-M-grid path and
    # (b) the tiled K-accumulation path when forced.
    B3, K3, N3 = 512, 1024, 384
    x3 = jax.random.normal(k_x3, (B3, K3), dtype=jnp.float32)
    p3 = init_tnet_params(k_p3, K3, N3)
    y3_ref = x3 @ p3.w_pad[:K3, :N3] + p3.b_pad[0, :N3]

    y3a = jax.block_until_ready(tnet_forward(x3, p3))                          # resident
    y3b = jax.block_until_ready(tnet_forward(x3, p3, small_path_max_bytes=0))  # tiled
    assert y3a.shape == (B3, N3) and y3b.shape == (B3, N3)
    assert jnp.allclose(y3a, y3_ref, atol=2e-3, rtol=2e-3)
    assert jnp.allclose(y3b, y3_ref, atol=2e-3, rtol=2e-3)

    print("KERNEL_OK")
</pallas_src>

<mosaic_0001>
module attributes {stable_mosaic.version = 11 : i64} {
  func.func @_linear_resident_kernel(%arg0: i32, %arg1: memref<8x128xf32, #tpu.memory_space<vmem>>, %arg2: memref<128x128xf32, #tpu.memory_space<vmem>>, %arg3: memref<1x128xf32, #tpu.memory_space<vmem>>, %arg4: memref<8x128xf32, #tpu.memory_space<vmem>>) attributes {dimension_semantics = [#tpu.dimension_semantics<parallel>], iteration_bounds = array<i64: 1>, scalar_prefetch = 0 : i64, scratch_operands = 0 : i64, tpu.core_type = #tpu.core_type<tc>, window_params = [{transform_indices = @transform_0, window_bounds = array<i64: 8, 128>}, {pipeline_mode = #tpu.pipeline_mode<synchronous>, transform_indices = @transform_1, window_bounds = array<i64: 128, 128>}, {pipeline_mode = #tpu.pipeline_mode<synchronous>, transform_indices = @transform_2, window_bounds = array<i64: 1, 128>}, {transform_indices = @transform_3, window_bounds = array<i64: 8, 128>}]} {
    %c0 = arith.constant 0 : index
    %c0_0 = arith.constant 0 : index
    %0 = vector.load %arg1[%c0, %c0_0] : memref<8x128xf32, #tpu.memory_space<vmem>>, vector<8x128xf32>
    %c0_1 = arith.constant 0 : index
    %c0_2 = arith.constant 0 : index
    %1 = vector.load %arg2[%c0_1, %c0_2] : memref<128x128xf32, #tpu.memory_space<vmem>>, vector<128x128xf32>
    %cst = arith.constant dense<0.000000e+00> : vector<8x128xf32>
    %2 = tpu.matmul %0, %1, %cst {dimension_numbers = #tpu.dot_dimension_numbers<[1], [0], [0], [1], [0, 0, 1, 1], [], []>} : vector<8x128xf32>, vector<128x128xf32>, vector<8x128xf32> -> vector<8x128xf32>
    %c0_3 = arith.constant 0 : index
    %c0_4 = arith.constant 0 : index
    %3 = vector.load %arg3[%c0_3, %c0_4] : memref<1x128xf32, #tpu.memory_space<vmem>>, vector<1x128xf32>
    %4 = vector.broadcast %3 : vector<1x128xf32> to vector<8x128xf32>
    %5 = arith.addf %2, %4 : vector<8x128xf32>
    %c0_5 = arith.constant 0 : index
    %c0_6 = arith.constant 0 : index
    %6 = vector.load %arg4[%c0_5, %c0_6] : memref<8x128xf32, #tpu.memory_space<vmem>>, vector<8x128xf32>
    tpu.vector_store %arg4[%c0_5, %c0_6], %5 {strides = array<i32>} : memref<8x128xf32, #tpu.memory_space<vmem>>, vector<8x128xf32>,
    return
  }
  func.func @transform_0(%arg0: i32) -> (i32, i32) {
    %c0_i32 = arith.constant 0 : i32
    %c0_i32_0 = arith.constant 0 : i32
    return %arg0, %c0_i32 : i32, i32
  }
  func.func @transform_1(%arg0: i32) -> (i32, i32) {
    %c0_i32 = arith.constant 0 : i32
    %c0_i32_0 = arith.constant 0 : i32
    %c0_i32_1 = arith.constant 0 : i32
    return %c0_i32, %c0_i32_0 : i32, i32
  }
  func.func @transform_2(%arg0: i32) -> (i32, i32) {
    %c0_i32 = arith.constant 0 : i32
    %c0_i32_0 = arith.constant 0 : i32
    %c0_i32_1 = arith.constant 0 : i32
    return %c0_i32, %c0_i32_0 : i32, i32
  }
  func.func @transform_3(%arg0: i32) -> (i32, i32) {
    %c0_i32 = arith.constant 0 : i32
    %c0_i32_0 = arith.constant 0 : i32
    return %arg0, %c0_i32 : i32, i32
  }
}

</mosaic_0001>

<bundles_post_ra>
// kernel: tpu_custom_call.1
= control target key start
LH: loop header
LB: loop body
LE: loop exit
PB: predicated region body
PF: predicated region fallthrough
CT: control target
= control target key end

     0   :  { %8 = vsyncpa [#allocation3], 0  ;;  %s383_s0 = inlined_call_operand.hbm [shape: f32[8,128], index: 0, kind: input, shape index: {}]   ;;  %s384_s1 = inlined_call_operand.hbm [shape: f32[128,128], index: 1, kind: input, shape index: {}]   ;;  %s385_s2 = inlined_call_operand.vmem [shape: f32[1,128], index: 2, kind: input, shape index: {}]   ;;  %s386_s3 = inlined_call_operand.hbm [shape: f32[8,128], index: 3, kind: output, shape index: {}]  }
   0x1   :  { %9 = vsyncpa [#allocation6], 0 }
   0x2   :  { %10 = vsyncpa [#allocation4], 0  ;;  %s309_s12 = smov [#allocation2]   ;;  %s310_s14 = smov [#allocation5]  }
   0x3   :  { %s17_s13 = sshll.u32 %s309_s12, 4  ;;  %s26_s15 = sshll.u32 %s310_s14, 4  ;;  %s18_s13 = int_to_ptr.vmem [resolvable:$true] %s17_s13  ;;  %s337_s15 = int_to_ptr.vmem [resolvable:$true] %s26_s15 }
   0x4   :  { %s237_s18 = scalar_lea.hbm %s383_s0, 128 }
   0x5   :  { %p238_p0 = scmp.ne.s32.totalorder %s383_s0, %s237_s18  ;;  %p241_p1 = scmp.lt.u32.totalorder %s237_s18, %s383_s0 }
   0x7   :  { %p243_p2 = pnand %p241_p1, %p238_p0 }
   0x9   :  { %246 = shalt.err (!%p243_p2)
}
   0xa   :  { %s247_s23 = scalar_lea.vmem %s18_s13, 128  ;;  %p252_p4 = scmp.lt.s32.totalorder %s18_s13, %s18_s13 }
   0xb   :  { %p248_p3 = scmp.ne.s32.totalorder %s18_s13, %s247_s23  ;;  %p253_p5 = scmp.lt.s32.totalorder %s247_s23, %s247_s23 }
   0xd   :  { %p254_p6 = por %p253_p5, %p252_p4 }
   0xf   :  { %p255_p7 = pnand %p254_p6, %p248_p3 }
  0x11   :  { %258 = shalt.err (!%p255_p7)
}
  0x12   :  { %20 = dma.hbm_to_vmem [thread:$0]  %s383_s0, 128, %s18_s13, [#allocation3]  }
  0x13   :  { %s259_s28 = scalar_lea.hbm %s384_s1, 2048 }
  0x14   :  { %p260_p8 = scmp.ne.s32.totalorder %s384_s1, %s259_s28  ;;  %p263_p9 = scmp.lt.u32.totalorder %s259_s28, %s384_s1 }
  0x16   :  { %p265_p10 = pnand %p263_p9, %p260_p8 }
  0x18   :  { %268 = shalt.err (!%p265_p10)
}
  0x19   :  { %s269_s6 = scalar_lea.vmem %s337_s15, 2048  ;;  %p274_p12 = scmp.lt.s32.totalorder %s337_s15, %s337_s15 }
  0x1a   :  { %p270_p11 = scmp.ne.s32.totalorder %s337_s15, %s269_s6  ;;  %p275_p13 = scmp.lt.s32.totalorder %s269_s6, %s269_s6 }
  0x1c   :  { %p276_p0 = por %p275_p13, %p274_p12 }
  0x1e   :  { %p277_p1 = pnand %p276_p0, %p270_p11 }
  0x20   :  { %280 = shalt.err (!%p277_p1)
}
  0x21   :  { %s311_s0 = smov 128   ;;  %s312_s7 = smov 8  }
  0x22   :  { %32 = dma.hbm_to_vmem [thread:$0]  %s384_s1, 2048, %s337_s15, [#allocation6], %s311_s0, %s311_s0, %s312_s7  }
  0x23   :  { %303 = dma.done.wait [#allocation3], 128  }
  0x24   :  { %304 = vsyncadd [#allocation3], 4294967168 }
  0x25   :  { %305 = dma.done.wait [#allocation6], 2048  }
  0x26   :  { %306 = vsyncadd [#allocation6], 4294965248  ;;  %v313_v0 = vmov 0.0|0.0   ;;  %vm314_vm0 = vmmov 0   ;;  %v315_v1 = vmov 0.0   ;;  %v42_v2 = vld [vmem:[#allocation5] sm:$0xff] }
  0x27   :  { %205 = vmatprep.subr.bf16.mxu0 %v313_v0  ;;  %202 = vmatprep.mubr.msk.f32.mxu0 %vm314_vm0, %v315_v1  ;;  %v43_v3 = vld [vmem:[#allocation5 + $0x8] sm:$0xff]  ;;  %v44_v4 = vld [vmem:[#allocation5 + $0x10] sm:$0xff]  ;;  %v45_v6 = vld [vmem:[#allocation5 + $0x18] sm:$0xff]  ;;  %s316_s11 = smov [#allocation7]  }
  0x28   :  { %v206_v5 = vpack.c.bf16 %v43_v3, %v42_v2  ;;  %v209_v7 = vpack.c.bf16 %v45_v6, %v44_v4  ;;  %v46_v8 = vld [vmem:[#allocation5 + $0x20] sm:$0xff]  ;;  %v47_v9 = vld [vmem:[#allocation5 + $0x28] sm:$0xff]  ;;  %v48_v11 = vld [vmem:[#allocation5 + $0x30] sm:$0xff]  ;;  %s142_s12 = sshll.u32 %s316_s11, 4  ;;  %s143_s12 = int_to_ptr.vmem [resolvable:$true] %s142_s12 }
  0x29   :  { %v212_v10 = vpack.c.bf16 %v47_v9, %v46_v8  ;;  %v49_v12 = vld [vmem:[#allocation5 + $0x38] sm:$0xff]  ;;  %v50_v14 = vld [vmem:[#allocation5 + $0x40] sm:$0xff]  ;;  %v51_v15 = vld [vmem:[#allocation5 + $0x48] sm:$0xff]  ;;  %s281_s13 = scalar_lea.vmem %s143_s12, 128  ;;  %p286_p3 = scmp.lt.s32.totalorder %s143_s12, %s143_s12 }
  0x2a   :  { %207 = vmatpush3.bf16.msra.mxu0 %v206_v5  ;;  %v215_v13 = vpack.c.bf16 %v49_v12, %v48_v11  ;;  %v218_v16 = vpack.c.bf16 %v51_v15, %v50_v14  ;;  %v52_v17 = vld [vmem:[#allocation5 + $0x50] sm:$0xff]  ;;  %v53_v18 = vld [vmem:[#allocation5 + $0x58] sm:$0xff]  ;;  %v54_v20 = vld [vmem:[#allocation5 + $0x60] sm:$0xff]  ;;  %p282_p2 = scmp.ne.s32.totalorder %s143_s12, %s281_s13  ;;  %p287_p4 = scmp.lt.s32.totalorder %s281_s13, %s281_s13 }
  0x2b   :  { %208 = vmatprep.subr.bf16.mxu0 %v313_v0  ;;  %v221_v19 = vpack.c.bf16 %v53_v18, %v52_v17  ;;  %v55_v21 = vld [vmem:[#allocation5 + $0x68] sm:$0xff]  ;;  %v56_v23 = vld [vmem:[#allocation5 + $0x70] sm:$0xff]  ;;  %v57_v24 = vld [vmem:[#allocation5 + $0x78] sm:$0xff] }
  0x2c   :  { %v224_v22 = vpack.c.bf16 %v55_v21, %v54_v20  ;;  %v227_v25 = vpack.c.bf16 %v57_v24, %v56_v23  ;;  %v41_v26 = vld [vmem:[#allocation2] sm:$0xff]  ;;  %p288_p5 = por %p287_p4, %p286_p3 }
  0x2d   :  { %v152_v27 = vld [vmem:[%s385_s2] ss:$0 sm:$0xff] }
  0x2e   :  { %210 = vmatpush3.bf16.msra.mxu0 %v209_v7  ;;  %p289_p6 = pnand %p288_p5, %p282_p2 }
  0x2f   :  { %211 = vmatprep.subr.bf16.mxu0 %v313_v0 }
  0x32   :  { %213 = vmatpush3.bf16.msra.mxu0 %v212_v10 }
  0x33   :  { %214 = vmatprep.subr.bf16.mxu0 %v313_v0 }
  0x36   :  { %216 = vmatpush3.bf16.msra.mxu0 %v215_v13 }
  0x37   :  { %217 = vmatprep.subr.bf16.mxu0 %v313_v0 }
  0x3a   :  { %219 = vmatpush3.bf16.msra.mxu0 %v218_v16 }
  0x3b   :  { %220 = vmatprep.subr.bf16.mxu0 %v313_v0 }
  0x3e   :  { %222 = vmatpush3.bf16.msra.mxu0 %v221_v19 }
  0x3f   :  { %223 = vmatprep.subr.bf16.mxu0 %v313_v0 }
  0x42   :  { %225 = vmatpush3.bf16.msra.mxu0 %v224_v22 }
  0x43   :  { %226 = vmatprep.subr.bf16.mxu0 %v313_v0 }
  0x46   :  { %228 = vmatpush3.bf16.msra.mxu0 %v227_v25 }
  0x49   :  { %203 = vmatmul.mubr.f32.vlgmr.msra.gmra.mrb[0].mxu0 %v41_v26 }
 0x11c   :  { %v131_v28 = vpop.f32.mrb[0].mxu0 }
 0x11d   :  { %v132_v29 = vadd.f32 %v152_v27, %v131_v28  ;;  %v204_v30 = vpop.f32.mrb[1].mxu0 }
 0x11f   :  { %135 = vst [vmem:[#allocation7] sm:$0xff] %v132_v29 }
 0x120   :  { %292 = shalt.err (!%p289_p6)
}
 0x121   :  { %s293_s16 = scalar_lea.hbm %s386_s3, 128 }
 0x122   :  { %p294_p7 = scmp.ne.s32.totalorder %s386_s3, %s293_s16  ;;  %p297_p8 = scmp.lt.u32.totalorder %s293_s16, %s386_s3 }
 0x124   :  { %p299_p9 = pnand %p297_p8, %p294_p7 }
 0x126   :  { %302 = shalt.err (!%p299_p9)
}
 0x127   :  { %145 = dma.vmem_to_hbm [thread:$0]  %s143_s12, 128, %s386_s3, [#allocation4]  }
 0x128   :  { %307 = dma.done.wait [#allocation4], 128  }
 0x129   :  { %308 = vsyncadd [#allocation4], 4294967168 }
 0x12a   :  { %149 = vsyncpa [#allocation3], 1 }
 0x12b   :  { %150 = vsyncpa [#allocation6], 1 }
 0x12c   :  { %151 = vsyncpa [#allocation4], 1 }

</bundles_post_ra>
